<compile_context>
chip_gen: v5e
topology: v5e:2x2
jax: 0.10.0
libtpu: 0.0.40
codegen_flags: <defaults>
</compile_context>

<pallas_src>
import jax
import jax.numpy as jnp
from jax.experimental import pallas as pl
from jax.experimental.pallas import tpu as pltpu


def _round_up(v, m):
    return (v + m - 1) // m * m


def film_kernel(x_ref, y_ref, wgb_ref, bgb_ref, wo_ref, bo_ref, o_ref):
    dim_p = y_ref.shape[-1]

    # Fused fc layer: one MXU pass -> (TILE_B, 2*dim_p), f32 accumulation.
    gb = jnp.dot(x_ref[...], wgb_ref[...], preferred_element_type=jnp.float32)
    gb = gb + bgb_ref[...]
    gamma = gb[:, :dim_p]        # dim_p % 128 == 0 -> lane-tile-aligned slice
    beta = gb[:, dim_p:]

    # FiLM modulation in f32.
    z = gamma * y_ref[...].astype(jnp.float32) + beta

    # fc_out: bf16 operands on the MXU, f32 accumulation.
    out = jnp.dot(z.astype(wo_ref.dtype), wo_ref[...],
                  preferred_element_type=jnp.float32) + bo_ref[...]

    # Numerically-stable softplus: max(x,0) + log1p(exp(-|x|)).
    o_ref[...] = jnp.maximum(out, 0.0) + jnp.log1p(jnp.exp(-jnp.abs(out)))


def prepare_film_params(w_fc, b_fc, w_out, b_out, *, dim,
                        compute_dtype=jnp.bfloat16):
    """One-time (model-load-time) weight preparation — NOT per-call.

    w_fc : (2*dim, input_dim)  PyTorch Linear layout
    b_fc : (2*dim,)
    w_out: (output_dim, dim)
    b_out: (output_dim,)
    Splits fc into gamma/beta halves, transposes to (in, out), zero-pads every
    dim to a multiple of 128 (lane-dense), fuses gamma/beta into one weight,
    and casts matmul operands to `compute_dtype`.
    """
    two_dim, input_dim = w_fc.shape
    assert two_dim == 2 * dim
    output_dim, dim_in = w_out.shape
    assert dim_in == dim

    idp = _round_up(input_dim, 128)
    dp = _round_up(dim, 128)
    odp = _round_up(output_dim, 128)

    def pad2(w, rows, cols):
        return jnp.pad(w, ((0, rows - w.shape[0]), (0, cols - w.shape[1])))

    wg = pad2(w_fc[:dim, :].T, idp, dp)            # (idp, dp)
    wb = pad2(w_fc[dim:2 * dim, :].T, idp, dp)     # (idp, dp)
    w_gb = jnp.concatenate([wg, wb], axis=1).astype(compute_dtype)  # (idp, 2dp)

    bg = jnp.pad(b_fc[:dim], (0, dp - dim))
    bb = jnp.pad(b_fc[dim:2 * dim], (0, dp - dim))
    b_gb = jnp.concatenate([bg, bb]).reshape(1, 2 * dp).astype(jnp.float32)

    w_o = pad2(w_out.T, dp, odp).astype(compute_dtype)               # (dp, odp)
    b_o = jnp.pad(b_out, (0, odp - output_dim)).reshape(1, odp).astype(jnp.float32)

    meta = dict(input_dim=input_dim, dim=dim, output_dim=output_dim,
                idp=idp, dp=dp, odp=odp, compute_dtype=compute_dtype)
    return (w_gb, b_gb, w_o, b_o), meta


def _pick_tile_b(batch, idp, dp, odp, compute_itemsize):
    """Largest batch tile (<=512 rows, multiple of 8) such that the resident
    weights + double-buffered activation tiles + f32 intermediates stay well
    under a v7x-safe scoped-VMEM budget."""
    budget = 24 * 1024 * 1024
    weight_bytes = (idp * 2 * dp + dp * odp) * compute_itemsize + (2 * dp + odp) * 4
    per_row = (2 * (idp + dp) * compute_itemsize     # double-buffered x, y
               + 2 * odp * 4                         # double-buffered f32 out
               + (2 * dp + dp + odp) * 4)            # in-kernel f32 gb, z, out
    avail = max(budget - weight_bytes, 1 << 20)
    tile = min(512, max(8, avail // per_row), _round_up(batch, 8))
    return max(8, (tile // 8) * 8)


def film_forward(x, y, prepared_params, meta):
    """x: (B, input_dim), y: (B, dim). Returns softplus(fc_out(gamma*y+beta))."""
    w_gb, b_gb, w_o, b_o = prepared_params
    input_dim, dim, output_dim = meta["input_dim"], meta["dim"], meta["output_dim"]
    idp, dp, odp = meta["idp"], meta["dp"], meta["odp"]
    cdt = meta["compute_dtype"]
    itemsize = jnp.dtype(cdt).itemsize

    B = x.shape[0]
    tile_b = _pick_tile_b(B, idp, dp, odp, itemsize)
    bp = _round_up(B, tile_b)

    x_p = jnp.pad(x, ((0, bp - B), (0, idp - input_dim))).astype(cdt)
    y_p = jnp.pad(y, ((0, bp - B), (0, dp - dim))).astype(cdt)

    flops = 2 * bp * (idp * 2 * dp + dp * odp)
    transcendentals = 2 * bp * odp
    bytes_accessed = ((x_p.size + y_p.size) * itemsize
                      + (w_gb.size + w_o.size) * itemsize
                      + (b_gb.size + b_o.size) * 4
                      + bp * odp * 4)

    out = pl.pallas_call(
        film_kernel,
        out_shape=jax.ShapeDtypeStruct((bp, odp), jnp.float32),
        grid_spec=pltpu.PrefetchScalarGridSpec(
            num_scalar_prefetch=0,
            grid=(bp // tile_b,),
            in_specs=[
                pl.BlockSpec((tile_b, idp), lambda i: (i, 0)),   # x tile
                pl.BlockSpec((tile_b, dp), lambda i: (i, 0)),    # y tile
                pl.BlockSpec((idp, 2 * dp), lambda i: (0, 0)),   # fused fc W (resident)
                pl.BlockSpec((1, 2 * dp), lambda i: (0, 0)),     # fused fc b
                pl.BlockSpec((dp, odp), lambda i: (0, 0)),       # fc_out W (resident)
                pl.BlockSpec((1, odp), lambda i: (0, 0)),        # fc_out b
            ],
            out_specs=pl.BlockSpec((tile_b, odp), lambda i: (i, 0)),
        ),
        compiler_params=pltpu.CompilerParams(
            dimension_semantics=("parallel",),        # shard batch axis over TCs (v7x)
            vmem_limit_bytes=48 * 1024 * 1024,        # < 64 MiB v7x physical
        ),
        cost_estimate=pl.CostEstimate(
            flops=int(flops),
            transcendentals=int(transcendentals),
            bytes_accessed=int(bytes_accessed)),
    )(x_p, y_p, w_gb, b_gb, w_o, b_o)

    return out[:B, :output_dim]


def film_reference(x, y, w_fc, b_fc, w_out, b_out, *, dim):
    h = x @ w_fc.T + b_fc
    gamma, beta = h[:, :dim], h[:, dim:2 * dim]
    z = gamma * y + beta
    out = z @ w_out.T + b_out
    return jax.nn.softplus(out)


if __name__ == "__main__":
    # Small shapes consistent with the module (split only makes sense when
    # input_dim == dim, as in the PyTorch module's usage).
    B, INPUT_DIM, DIM, OUTPUT_DIM = 8, 32, 32, 64

    key = jax.random.PRNGKey(0)
    k_x, k_y, k_wfc, k_bfc, k_wo, k_bo = jax.random.split(key, 6)

    x = jax.random.normal(k_x, (B, INPUT_DIM), dtype=jnp.float32)
    y = jax.random.normal(k_y, (B, DIM), dtype=jnp.float32)

    # Deterministic synthetic parameters (PyTorch Linear weight shapes).
    w_fc = jax.random.normal(k_wfc, (2 * DIM, INPUT_DIM), jnp.float32) * 0.1
    b_fc = jax.random.normal(k_bfc, (2 * DIM,), jnp.float32) * 0.1
    w_out = jax.random.normal(k_wo, (OUTPUT_DIM, DIM), jnp.float32) * 0.1
    b_out = jax.random.normal(k_bo, (OUTPUT_DIM,), jnp.float32) * 0.1

    # One-time weight prep, hoisted off the per-call path.
    params, meta = prepare_film_params(w_fc, b_fc, w_out, b_out, dim=DIM)
    params = tuple(jax.block_until_ready(p) for p in params)

    out = film_forward(x, y, params, meta)
    out = jax.block_until_ready(out)

    ref = film_reference(x, y, w_fc, b_fc, w_out, b_out, dim=DIM)
    assert out.shape == (B, OUTPUT_DIM)
    # bf16 matmul operands with f32 accumulation -> relaxed tolerance.
    assert jnp.allclose(out, ref, atol=3e-2, rtol=3e-2), "mismatch vs reference"

    print("KERNEL_OK")
</pallas_src>

<mosaic_0001>
module attributes {stable_mosaic.version = 11 : i64} {
  func.func @film_kernel(%arg0: i32, %arg1: memref<8x128xbf16, #tpu.memory_space<vmem>>, %arg2: memref<8x128xbf16, #tpu.memory_space<vmem>>, %arg3: memref<128x256xbf16, #tpu.memory_space<vmem>>, %arg4: memref<1x256xf32, #tpu.memory_space<vmem>>, %arg5: memref<128x128xbf16, #tpu.memory_space<vmem>>, %arg6: memref<1x128xf32, #tpu.memory_space<vmem>>, %arg7: memref<8x128xf32, #tpu.memory_space<vmem>>) attributes {dimension_semantics = [#tpu.dimension_semantics<parallel>], iteration_bounds = array<i64: 1>, scalar_prefetch = 0 : i64, scratch_operands = 0 : i64, tpu.core_type = #tpu.core_type<tc>, window_params = [{transform_indices = @transform_0, window_bounds = array<i64: 8, 128>}, {transform_indices = @transform_1, window_bounds = array<i64: 8, 128>}, {pipeline_mode = #tpu.pipeline_mode<synchronous>, transform_indices = @transform_2, window_bounds = array<i64: 128, 256>}, {pipeline_mode = #tpu.pipeline_mode<synchronous>, transform_indices = @transform_3, window_bounds = array<i64: 1, 256>}, {pipeline_mode = #tpu.pipeline_mode<synchronous>, transform_indices = @transform_4, window_bounds = array<i64: 128, 128>}, {pipeline_mode = #tpu.pipeline_mode<synchronous>, transform_indices = @transform_5, window_bounds = array<i64: 1, 128>}, {transform_indices = @transform_6, window_bounds = array<i64: 8, 128>}]} {
    %c0 = arith.constant 0 : index
    %c0_0 = arith.constant 0 : index
    %0 = vector.load %arg1[%c0, %c0_0] : memref<8x128xbf16, #tpu.memory_space<vmem>>, vector<8x128xbf16>
    %c0_1 = arith.constant 0 : index
    %c0_2 = arith.constant 0 : index
    %1 = vector.load %arg3[%c0_1, %c0_2] : memref<128x256xbf16, #tpu.memory_space<vmem>>, vector<128x256xbf16>
    %cst = arith.constant dense<0.000000e+00> : vector<8x256xf32>
    %2 = tpu.matmul %0, %1, %cst {dimension_numbers = #tpu.dot_dimension_numbers<[1], [0], [0], [1], [0, 0, 1, 1], [], []>} : vector<8x128xbf16>, vector<128x256xbf16>, vector<8x256xf32> -> vector<8x256xf32>
    %c0_3 = arith.constant 0 : index
    %c0_4 = arith.constant 0 : index
    %3 = vector.load %arg4[%c0_3, %c0_4] : memref<1x256xf32, #tpu.memory_space<vmem>>, vector<1x256xf32>
    %4 = vector.broadcast %3 : vector<1x256xf32> to vector<8x256xf32>
    %5 = arith.addf %2, %4 : vector<8x256xf32>
    %6 = vector.extract_strided_slice %5 {offsets = [0, 0], sizes = [8, 128], strides = [1, 1]} : vector<8x256xf32> to vector<8x128xf32>
    %7 = vector.extract_strided_slice %5 {offsets = [0, 128], sizes = [8, 128], strides = [1, 1]} : vector<8x256xf32> to vector<8x128xf32>
    %c0_5 = arith.constant 0 : index
    %c0_6 = arith.constant 0 : index
    %8 = vector.load %arg2[%c0_5, %c0_6] : memref<8x128xbf16, #tpu.memory_space<vmem>>, vector<8x128xbf16>
    %9 = arith.extf %8 : vector<8x128xbf16> to vector<8x128xf32>
    %10 = arith.mulf %6, %9 : vector<8x128xf32>
    %11 = arith.addf %10, %7 : vector<8x128xf32>
    %12 = arith.truncf %11 : vector<8x128xf32> to vector<8x128xbf16>
    %c0_7 = arith.constant 0 : index
    %c0_8 = arith.constant 0 : index
    %13 = vector.load %arg5[%c0_7, %c0_8] : memref<128x128xbf16, #tpu.memory_space<vmem>>, vector<128x128xbf16>
    %cst_9 = arith.constant dense<0.000000e+00> : vector<8x128xf32>
    %14 = tpu.matmul %12, %13, %cst_9 {dimension_numbers = #tpu.dot_dimension_numbers<[1], [0], [0], [1], [0, 0, 1, 1], [], []>} : vector<8x128xbf16>, vector<128x128xbf16>, vector<8x128xf32> -> vector<8x128xf32>
    %c0_10 = arith.constant 0 : index
    %c0_11 = arith.constant 0 : index
    %15 = vector.load %arg6[%c0_10, %c0_11] : memref<1x128xf32, #tpu.memory_space<vmem>>, vector<1x128xf32>
    %16 = vector.broadcast %15 : vector<1x128xf32> to vector<8x128xf32>
    %17 = arith.addf %14, %16 : vector<8x128xf32>
    %cst_12 = arith.constant 0.000000e+00 : f32
    %18 = vector.broadcast %cst_12 : f32 to vector<8x128xf32>
    %19 = arith.maximumf %17, %18 : vector<8x128xf32>
    %20 = math.absf %17 : vector<8x128xf32>
    %cst_13 = arith.constant 0.000000e+00 : f32
    %21 = vector.broadcast %cst_13 : f32 to vector<8x128xf32>
    %22 = arith.subf %21, %20 : vector<8x128xf32>
    %23 = math.exp %22 : vector<8x128xf32>
    %24 = math.log1p %23 : vector<8x128xf32>
    %25 = arith.addf %19, %24 : vector<8x128xf32>
    %c0_14 = arith.constant 0 : index
    %c0_15 = arith.constant 0 : index
    %26 = vector.load %arg7[%c0_14, %c0_15] : memref<8x128xf32, #tpu.memory_space<vmem>>, vector<8x128xf32>
    tpu.vector_store %arg7[%c0_14, %c0_15], %25 {strides = array<i32>} : memref<8x128xf32, #tpu.memory_space<vmem>>, vector<8x128xf32>,
    return
  }
  func.func @transform_0(%arg0: i32) -> (i32, i32) {
    %c0_i32 = arith.constant 0 : i32
    %c0_i32_0 = arith.constant 0 : i32
    return %arg0, %c0_i32 : i32, i32
  }
  func.func @transform_1(%arg0: i32) -> (i32, i32) {
    %c0_i32 = arith.constant 0 : i32
    %c0_i32_0 = arith.constant 0 : i32
    return %arg0, %c0_i32 : i32, i32
  }
  func.func @transform_2(%arg0: i32) -> (i32, i32) {
    %c0_i32 = arith.constant 0 : i32
    %c0_i32_0 = arith.constant 0 : i32
    %c0_i32_1 = arith.constant 0 : i32
    return %c0_i32, %c0_i32_0 : i32, i32
  }
  func.func @transform_3(%arg0: i32) -> (i32, i32) {
    %c0_i32 = arith.constant 0 : i32
    %c0_i32_0 = arith.constant 0 : i32
    %c0_i32_1 = arith.constant 0 : i32
    return %c0_i32, %c0_i32_0 : i32, i32
  }
  func.func @transform_4(%arg0: i32) -> (i32, i32) {
    %c0_i32 = arith.constant 0 : i32
    %c0_i32_0 = arith.constant 0 : i32
    %c0_i32_1 = arith.constant 0 : i32
    return %c0_i32, %c0_i32_0 : i32, i32
  }
  func.func @transform_5(%arg0: i32) -> (i32, i32) {
    %c0_i32 = arith.constant 0 : i32
    %c0_i32_0 = arith.constant 0 : i32
    %c0_i32_1 = arith.constant 0 : i32
    return %c0_i32, %c0_i32_0 : i32, i32
  }
  func.func @transform_6(%arg0: i32) -> (i32, i32) {
    %c0_i32 = arith.constant 0 : i32
    %c0_i32_0 = arith.constant 0 : i32
    return %arg0, %c0_i32 : i32, i32
  }
}

</mosaic_0001>

<bundles_post_ra>
// kernel: tpu_custom_call.1
= control target key start
LH: loop header
LB: loop body
LE: loop exit
PB: predicated region body
PF: predicated region fallthrough
CT: control target
= control target key end

     0   :  { %11 = vsyncpa [#allocation3], 0  ;;  %s660_s0 = inlined_call_operand.hbm [shape: bf16[8,128], index: 0, kind: input, shape index: {}]   ;;  %s661_s1 = inlined_call_operand.hbm [shape: bf16[8,128], index: 1, kind: input, shape index: {}]   ;;  %s662_s2 = inlined_call_operand.hbm [shape: bf16[128,256], index: 2, kind: input, shape index: {}]   ;;  %s663_s3 = inlined_call_operand.vmem [shape: f32[1,256], index: 3, kind: input, shape index: {}]   ;;  %s664_s4 = inlined_call_operand.hbm [shape: bf16[128,128], index: 4, kind: input, shape index: {}]   ;;  %s665_s5 = inlined_call_operand.vmem [shape: f32[1,128], index: 5, kind: input, shape index: {}]   ;;  %s666_s6 = inlined_call_operand.hbm [shape: f32[8,128], index: 6, kind: output, shape index: {}]  }
   0x1   :  { %12 = vsyncpa [#allocation6], 0 }
   0x2   :  { %13 = vsyncpa [#allocation9], 0  ;;  %s31_s23 = sshll.u32 %s661_s1, 4  ;;  %s32_s23 = int_to_ptr.hbm [resolvable:$true] %s31_s23 }
   0x3   :  { %14 = vsyncpa [#allocation4], 0  ;;  %s595_s24 = smov [#allocation5]   ;;  %s20_s28 = sshll.u32 %s660_s0, 4  ;;  %s21_s28 = int_to_ptr.hbm [resolvable:$true] %s20_s28 }
   0x4   :  { %s33_s25 = sshll.u32 %s595_s24, 4  ;;  %s596_s29 = smov [#allocation2]   ;;  %s34_s25 = int_to_ptr.vmem [resolvable:$true] %s33_s25 }
   0x5   :  { %36 = dma.hbm_to_vmem [thread:$0]  %s32_s23, 64, %s34_s25, [#allocation6]  }
   0x6   :  { %s22_s30 = sshll.u32 %s596_s29, 4  ;;  %s41_s9 = sshll.u32 %s662_s2, 4  ;;  %s23_s30 = int_to_ptr.vmem [resolvable:$true] %s22_s30  ;;  %s42_s9 = int_to_ptr.hbm [resolvable:$true] %s41_s9 }
   0x7   :  { %25 = dma.hbm_to_vmem [thread:$0]  %s21_s28, 64, %s23_s30, [#allocation3]  }
   0x8   :  { %s597_s1 = smov [#allocation7]   ;;  %s56_s13 = sshll.u32 %s664_s4, 4  ;;  %s57_s13 = int_to_ptr.hbm [resolvable:$true] %s56_s13 }
   0x9   :  { %s43_s10 = sshll.u32 %s597_s1, 4  ;;  %s598_s14 = smov 128   ;;  %s44_s10 = int_to_ptr.vmem [resolvable:$true] %s43_s10 }
   0xa   :  { %s599_s0 = smov 8   ;;  %s600_s15 = smov [#allocation8]  }
   0xb   :  { %49 = dma.hbm_to_vmem [thread:$0]  %s42_s9, 2048, %s44_s10, [#allocation6], %s598_s14, %s598_s14, %s599_s0  }
   0xc   :  { %s58_s16 = sshll.u32 %s600_s15, 4  ;;  %s601_s17 = smov 64   ;;  %s59_s16 = int_to_ptr.vmem [resolvable:$true] %s58_s16 }
   0xd   :  { %s602_s18 = smov 4  }
   0xe   :  { %64 = dma.hbm_to_vmem [thread:$0]  %s57_s13, 1024, %s59_s16, [#allocation9], %s601_s17, %s601_s17, %s602_s18  }
   0xf   :  { %587 = dma.done.wait [#allocation3], 64  }
  0x10   :  { %588 = vsyncadd [#allocation3], 4294967232 }
  0x11   :  { %589 = dma.done.wait [#allocation6], 2112  }
  0x12   :  { %590 = vsyncadd [#allocation6], 4294965184 }
  0x13   :  { %591 = dma.done.wait [#allocation9], 1024  }
  0x14   :  { %592 = vsyncadd [#allocation9], 4294966272  ;;  %v391_v0 = vld [vmem:[#allocation7 + $0x70] sm:$0xf]  ;;  %v444_v1 = vld [vmem:[#allocation7 + $0x74] sm:$0xf0] }
  0x15   :  { %v443_v2 = vld [vmem:[#allocation7 + $0x74] sm:$0xf]  ;;  %v392_v3 = vor.u32 %v444_v1, %v391_v0  ;;  %v393_v4 = vld [vmem:[#allocation7 + $0x78] sm:$0xf0]  ;;  %v383_v5 = vld [vmem:[#allocation7 + $0x60] sm:$0xf] }
  0x16   :  { %v442_v6 = vld [vmem:[#allocation7 + $0x64] sm:$0xf0]  ;;  %v396_v7 = vor.u32 %v443_v2, %v393_v4  ;;  %v441_v8 = vld [vmem:[#allocation7 + $0x64] sm:$0xf]  ;;  %v385_v9 = vld [vmem:[#allocation7 + $0x68] sm:$0xf0] }
  0x17   :  { %186 = vmatpush.bf16.msra.mxu0 %v392_v3  ;;  %v384_v10 = vor.u32 %v442_v6, %v383_v5  ;;  %v388_v11 = vor.u32 %v441_v8, %v385_v9  ;;  %v375_v12 = vld [vmem:[#allocation7 + $0x50] sm:$0xf]  ;;  %v440_v13 = vld [vmem:[#allocation7 + $0x54] sm:$0xf0]  ;;  %v439_v14 = vld [vmem:[#allocation7 + $0x54] sm:$0xf] }
  0x18   :  { %199 = vmatpush.bf16.msra.mxu1 %v396_v7  ;;  %v377_v15 = vld [vmem:[#allocation7 + $0x58] sm:$0xf0]  ;;  %v376_v16 = vor.u32 %v440_v13, %v375_v12  ;;  %v367_v18 = vld [vmem:[#allocation7 + $0x40] sm:$0xf]  ;;  %v438_v19 = vld [vmem:[#allocation7 + $0x44] sm:$0xf0] }
  0x19   :  { %v380_v17 = vor.u32 %v439_v14, %v377_v15  ;;  %v437_v20 = vld [vmem:[#allocation7 + $0x44] sm:$0xf]  ;;  %v369_v21 = vld [vmem:[#allocation7 + $0x48] sm:$0xf0]  ;;  %v368_v22 = vor.u32 %v438_v19, %v367_v18  ;;  %v452_v23 = vld [vmem:[#allocation8 + $0x38] sm:$0xff]  ;;  %s321_s23 = sshll.u32 %s666_s6, 4  ;;  %s322_s23 = int_to_ptr.hbm [resolvable:$true] %s321_s23 }
  0x1a   :  { %v372_v24 = vor.u32 %v437_v20, %v369_v21  ;;  %v359_v25 = vld [vmem:[#allocation7 + $0x30] sm:$0xf]  ;;  %v436_v26 = vld [vmem:[#allocation7 + $0x34] sm:$0xf0]  ;;  %v435_v27 = vld [vmem:[#allocation7 + $0x34] sm:$0xf]  ;;  %285 = vmatpush.bf16.msra.mxu2 %v452_v23 }
  0x1b   :  { %187 = vmatpush.bf16.msra.mxu0 %v384_v10  ;;  %v361_v28 = vld [vmem:[#allocation7 + $0x38] sm:$0xf0]  ;;  %v451_v29 = vld [vmem:[#allocation8 + $0x30] sm:$0xff]  ;;  %v360_v30 = vor.u32 %v436_v26, %v359_v25  ;;  %v351_v32 = vld [vmem:[#allocation7 + $0x20] sm:$0xf] }
  0x1c   :  { %200 = vmatpush.bf16.msra.mxu1 %v388_v11  ;;  %v364_v31 = vor.u32 %v435_v27, %v361_v28  ;;  %v434_v33 = vld [vmem:[#allocation7 + $0x24] sm:$0xf0]  ;;  %v433_v34 = vld [vmem:[#allocation7 + $0x24] sm:$0xf]  ;;  %v353_v35 = vld [vmem:[#allocation7 + $0x28] sm:$0xf0] }
  0x1d   :  { %v450_v36 = vld [vmem:[#allocation8 + $0x28] sm:$0xff]  ;;  %v352_v37 = vor.u32 %v434_v33, %v351_v32  ;;  %v356_v38 = vor.u32 %v433_v34, %v353_v35  ;;  %v343_v39 = vld [vmem:[#allocation7 + $0x10] sm:$0xf]  ;;  %v432_v40 = vld [vmem:[#allocation7 + $0x14] sm:$0xf0] }
  0x1e   :  { %286 = vmatpush.bf16.msra.mxu2 %v451_v29  ;;  %v431_v41 = vld [vmem:[#allocation7 + $0x14] sm:$0xf]  ;;  %v345_v42 = vld [vmem:[#allocation7 + $0x18] sm:$0xf0]  ;;  %v449_v43 = vld [vmem:[#allocation8 + $0x20] sm:$0xff]  ;;  %v344_v44 = vor.u32 %v432_v40, %v343_v39 }
  0x1f   :  { %188 = vmatpush.bf16.msra.mxu0 %v376_v16  ;;  %v348_v45 = vor.u32 %v431_v41, %v345_v42  ;;  %v335_v46 = vld [vmem:[#allocation7] sm:$0xf]  ;;  %v430_v47 = vld [vmem:[#allocation7 + $0x4] sm:$0xf0]  ;;  %v429_v48 = vld [vmem:[#allocation7 + $0x4] sm:$0xf] }
  0x20   :  { %201 = vmatpush.bf16.msra.mxu1 %v380_v17  ;;  %v337_v49 = vld [vmem:[#allocation7 + $0x8] sm:$0xf0]  ;;  %v448_v50 = vld [vmem:[#allocation8 + $0x18] sm:$0xff]  ;;  %v336_v51 = vor.u32 %v430_v47, %v335_v46  ;;  %v447_v53 = vld [vmem:[#allocation8 + $0x10] sm:$0xff] }
  0x21   :  { %v340_v52 = vor.u32 %v429_v48, %v337_v49  ;;  %v83_v54 = vld [vmem:[#allocation2] sm:$0xf]  ;;  %v446_v55 = vld [vmem:[#allocation8 + $0x8] sm:$0xff]  ;;  %v445_v56 = vld [vmem:[#allocation8] sm:$0xff] }
  0x22   :  { %287 = vmatpush.bf16.msra.mxu2 %v450_v36  ;;  %v100_v57 = vld [vmem:[%s663_s3] sm:$0x3]  ;;  %v212_v58 = vld [vmem:[#allocation5] sm:$0xf]  ;;  %s603_s3 = smov [#allocation10]  }
  0x23   :  { %189 = vmatpush.bf16.msra.mxu0 %v368_v22  ;;  %v102_v59 = vperm.slane %v100_v57, 0  ;;  %v103_v60 = vperm.slane %v100_v57, 1  ;;  %v213_v61 = vunpack.c.l.bf16 %v212_v58  ;;  %v462_v7 = vld [vmem:[%s665_s5] ss:$0 sm:$0xff]  ;;  %s319_s21 = sshll.u32 %s603_s3, 4  ;;  %s320_s21 = int_to_ptr.vmem [resolvable:$true] %s319_s21 }
  0x24   :  { %202 = vmatpush.bf16.msra.mxu1 %v372_v24 }
  0x26   :  { %288 = vmatpush.bf16.msra.mxu2 %v449_v43 }
  0x27   :  { %190 = vmatpush.bf16.msra.mxu0 %v360_v30 }
  0x28   :  { %203 = vmatpush.bf16.msra.mxu1 %v364_v31 }
  0x2a   :  { %289 = vmatpush.bf16.msra.mxu2 %v448_v50 }
  0x2b   :  { %191 = vmatpush.bf16.msra.mxu0 %v352_v37 }
  0x2c   :  { %204 = vmatpush.bf16.msra.mxu1 %v356_v38 }
  0x2e   :  { %290 = vmatpush.bf16.msra.mxu2 %v447_v53 }
  0x2f   :  { %192 = vmatpush.bf16.msra.mxu0 %v344_v44 }
  0x30   :  { %205 = vmatpush.bf16.msra.mxu1 %v348_v45 }
  0x32   :  { %291 = vmatpush.bf16.msra.mxu2 %v446_v55 }
  0x33   :  { %193 = vmatpush.bf16.msra.mxu0 %v336_v51 }
  0x34   :  { %206 = vmatpush.bf16.msra.mxu1 %v340_v52 }
  0x36   :  { %194 = vmatmul.bf16.vlgmr.msra.gmra.mxu0 %v83_v54  ;;  %292 = vmatpush.bf16.msra.mxu2 %v445_v56 }
  0x37   :  { %207 = vmatmul.bf16.vlgmr.msra.gmra.mxu1 %v83_v54 }
  0xb3   :  { %v195_v62 = vpop.f32.mrf.mxu0 }
  0xb4   :  { %v196_v63 = vadd.f32 %v195_v62, %v102_v59  ;;  %v208_v0 = vpop.f32.mrf.mxu1 }
  0xb5   :  { %v209_v1 = vadd.f32 %v208_v0, %v103_v60 }
  0xb6   :  { %v214_v2 = vmul.f32 %v213_v61, %v196_v63 }
  0xb8   :  { %v215_v3 = vadd.f32 %v214_v2, %v209_v1 }
  0xba   :  { %v216_v4 = vpack.c.bf16 %v215_v3, %v215_v3 }
  0xbb   :  { %v197_v5 = vpop.f32.mrf.mxu0 }
  0xbc   :  { %v210_v6 = vpop.f32.mrf.mxu1  ;;  %293 = vmatmul.bf16.vlgmr.msra.gmra.mxu2 %v216_v4 }
 0x13f   :  { %v294_v8 = vpop.f32.mrf.mxu2 }
 0x140   :  { %v295_v9 = vadd.f32 %v462_v7, %v294_v8 }
 0x142   :  { %v299_v10 = vand.u32 2147483647, %v295_v9  ;;  %v298_v22 = vmax.f32 %v295_v9, 0.0 }
 0x144   :  { %v300_v11 = vsub.f32 0.0, %v299_v10 }
 0x146   :  { %v301_v12 = vmul.f32 1.442695, %v300_v11 }
 0x147   :  { %v296_v13 = vpop.f32.mrf.mxu2 }
 0x148   :  { %463 = vpow2.f32 %v301_v12 }
 0x14e   :  { %v464_v14 = vpop.eup %463 }
 0x14f   :  { %v303_v15 = vadd.f32 1.0, %v464_v14  ;;  %v306_v16 = vmul.f32 -0.5, %v464_v14  ;;  %v309_v18 = vand.u32 2147483647, %v464_v14 }
 0x151   :  { %465 = vlog2.f32 %v303_v15  ;;  %v307_v17 = vadd.f32 1.0, %v306_v16  ;;  %vm310_vm0 = vcmp.lt.f32.partialorder %v309_v18, 0.0004427343 }
 0x153   :  { %v308_v21 = vmul.f32 %v464_v14, %v307_v17 }
 0x157   :  { %v466_v19 = vpop.eup %465 }
 0x158   :  { %v305_v20 = vmul.f32 0.6931472, %v466_v19 }
 0x15a   :  { %v311_v23 = vsel %vm310_vm0, %v308_v21, %v305_v20 }
 0x15b   :  { %v312_v24 = vadd.f32 %v311_v23, %v298_v22 }
 0x15d   :  { %313 = vst [vmem:[#allocation10] sm:$0xff] %v312_v24 }
 0x15e   :  { %324 = dma.vmem_to_hbm [thread:$0]  %s320_s21, 128, %s322_s23, [#allocation4]  }
 0x15f   :  { %593 = dma.done.wait [#allocation4], 128  }
 0x160   :  { %594 = vsyncadd [#allocation4], 4294967168 }
 0x161   :  { %329 = vsyncpa [#allocation3], 1 }
 0x162   :  { %330 = vsyncpa [#allocation6], 1 }
 0x163   :  { %331 = vsyncpa [#allocation9], 1 }
 0x164   :  { %332 = vsyncpa [#allocation4], 1 }

</bundles_post_ra>
